<compile_context>
chip_gen: v7x
topology: tpu7x:2x2x1
jax: 0.10.0
libtpu: 0.0.40
codegen_flags: <defaults>
</compile_context>

<pallas_src>
import functools

import jax
import jax.numpy as jnp
from jax.experimental import pallas as pl
from jax.experimental.pallas import tpu as pltpu

LANE = 128
SUBLANE = 8


def _round_up(n, m):
    return ((n + m - 1) // m) * m


def _vmem_bytes(tile_b, d_in, d_hid, d_lat_pad):
    """Rough VMEM footprint: double-buffered f32 activation tiles + bf16 weights + f32 biases."""
    act = 4 * tile_b * (2 * d_in + 3 * d_lat_pad)               # x, gen, eps, packed mulv
    wts = 2 * (d_in * d_hid + d_hid * 2 * d_lat_pad + d_lat_pad * d_hid + d_hid * d_in)
    bia = 4 * (2 * d_hid + 2 * d_lat_pad + d_in)
    return 2 * (act + wts + bia)


def _vae_kernel(x_ref, w1_ref, b1_ref, wml_ref, bml_ref, eps_ref,
                w3_ref, b3_ref, w4_ref, b4_ref,
                out_ref, mulv_ref):
    d_lat_pad = eps_ref.shape[-1]

    x = x_ref[...]                                              # f32 (tile_b, D_in)

    # ---- encoder hidden: bf16 operands on the MXU, f32 accumulate ----
    h = jnp.dot(x.astype(jnp.bfloat16), w1_ref[...],
                preferred_element_type=jnp.float32) + b1_ref[...]
    h = jnp.maximum(h, 0.0)

    # ---- fused mu | logvar head: one (D_hid, 2*d_lat_pad) matmul, lane-dense packed store ----
    mulv = jnp.dot(h.astype(jnp.bfloat16), wml_ref[...],
                   preferred_element_type=jnp.float32) + bml_ref[...]
    mulv_ref[...] = mulv

    mu = mulv[:, :d_lat_pad]                                    # lanes 0..127   (vreg-aligned)
    logvar = mulv[:, d_lat_pad:]                                # lanes 128..255 (vreg-aligned)

    # ---- reparameterization in f32: z = eps * exp(logvar/2) + mu ----
    # padded lanes: eps=0, mu=0, logvar=0 -> z=0, and padded w3 rows are zero.
    z = eps_ref[...] * jnp.exp(logvar * 0.5) + mu

    # ---- decoder ----
    h2 = jnp.dot(z.astype(jnp.bfloat16), w3_ref[...],
                 preferred_element_type=jnp.float32) + b3_ref[...]
    h2 = jnp.maximum(h2, 0.0)
    out_ref[...] = jnp.dot(h2.astype(jnp.bfloat16), w4_ref[...],
                           preferred_element_type=jnp.float32) + b4_ref[...]


@functools.partial(jax.jit, static_argnames=("tile_b",))
def vae_forward(x, params, eps, *, tile_b=1024):
    """Fused VAE forward. Returns (generated_spectra, z_mu, z_var)."""
    B, D_in = x.shape
    D_hid = params["w1"].shape[1]
    D_lat_pad = params["w3"].shape[0]
    D_lat = eps.shape[1]

    # Pad eps lanes to the padded latent width (tiny stream; keeps z a clean 128-lane tile).
    if D_lat != D_lat_pad:
        eps = jnp.pad(eps, ((0, 0), (0, D_lat_pad - D_lat)))

    # ---- batch tiling: large tiles, no host-side batch padding ----
    tile_b = max(SUBLANE, min(tile_b, _round_up(B, SUBLANE)))
    # stay comfortably inside VMEM (v7x: 64 MiB physical per TC)
    while tile_b > 256 and _vmem_bytes(tile_b, D_in, D_hid, D_lat_pad) > 40 * 2**20:
        tile_b = _round_up(tile_b // 2, SUBLANE)
    # give v7x's second TensorCore work: >= 2 grid steps when the batch allows
    if pl.cdiv(B, tile_b) < 2:
        tile_b = max(SUBLANE, min(tile_b, _round_up(pl.cdiv(B, 2), SUBLANE)))
    grid = (pl.cdiv(B, tile_b),)           # partial last block masked on store by Pallas

    row = lambda i: (i, 0)                 # batch-tiled arrays
    rep = lambda i: (0, 0)                 # weights/biases: VMEM-resident across grid steps

    in_specs = [
        pl.BlockSpec((tile_b, D_in), row),             # x
        pl.BlockSpec((D_in, D_hid), rep),              # w1 (bf16)
        pl.BlockSpec((1, D_hid), rep),                 # b1
        pl.BlockSpec((D_hid, 2 * D_lat_pad), rep),     # wmulv (bf16, fused mu|logvar, lane-padded)
        pl.BlockSpec((1, 2 * D_lat_pad), rep),         # bmulv
        pl.BlockSpec((tile_b, D_lat_pad), row),        # eps (lane-padded with zeros)
        pl.BlockSpec((D_lat_pad, D_hid), rep),         # w3 (bf16, zero-padded K rows)
        pl.BlockSpec((1, D_hid), rep),                 # b3
        pl.BlockSpec((D_hid, D_in), rep),              # w4 (bf16)
        pl.BlockSpec((1, D_in), rep),                  # b4
    ]
    out_specs = (
        pl.BlockSpec((tile_b, D_in), row),             # generated spectra
        pl.BlockSpec((tile_b, 2 * D_lat_pad), row),    # packed (mu | logvar), lane-dense
    )
    out_shapes = (
        jax.ShapeDtypeStruct((B, D_in), jnp.float32),
        jax.ShapeDtypeStruct((B, 2 * D_lat_pad), jnp.float32),
    )

    mm_terms = D_in * D_hid + D_hid * 2 * D_lat_pad + D_lat_pad * D_hid + D_hid * D_in
    cost = pl.CostEstimate(
        flops=2 * B * mm_terms,
        transcendentals=B * D_lat_pad,
        bytes_accessed=(2 * mm_terms                                  # bf16 weights
                        + 4 * (2 * D_hid + 2 * D_lat_pad + D_in)      # f32 biases
                        + 4 * B * (2 * D_in + 3 * D_lat_pad)),        # f32 activations in/out
    )

    vmem_limit = int(min(60 * 2**20,
                         max(32 * 2**20,
                             2 * _vmem_bytes(tile_b, D_in, D_hid, D_lat_pad))))

    gen, mulv = pl.pallas_call(
        _vae_kernel,
        out_shape=out_shapes,
        grid=grid,
        in_specs=in_specs,
        out_specs=out_specs,
        compiler_params=pltpu.CompilerParams(
            dimension_semantics=("parallel",),
            vmem_limit_bytes=vmem_limit,
        ),
        cost_estimate=cost,
    )(
        x,
        params["w1"], params["b1"],
        params["wmulv"], params["bmulv"],
        eps,
        params["w3"], params["b3"],
        params["w4"], params["b4"],
    )

    z_mu = mulv[:, :D_lat]
    z_var = mulv[:, D_lat_pad:D_lat_pad + D_lat]
    return gen, z_mu, z_var


def init_params(key, d_in, d_hid, d_lat):
    """nn.Linear-style init U(-1/sqrt(fan_in), 1/sqrt(fan_in)); weights stored bf16.
    mu/logvar heads fused and lane-padded: wmulv is (d_hid, 2*d_lat_pad) with mu in
    lanes [0:d_lat] and logvar in [d_lat_pad:d_lat_pad+d_lat]; w3's K dim zero-padded."""
    d_lat_pad = _round_up(d_lat, LANE)

    def linear(k, fan_in, fan_out):
        kw, kb = jax.random.split(k)
        bound = 1.0 / jnp.sqrt(fan_in)
        w = jax.random.uniform(kw, (fan_in, fan_out), jnp.float32, -bound, bound)
        b = jax.random.uniform(kb, (1, fan_out), jnp.float32, -bound, bound)
        return w, b

    k1, k2, k3, k4, k5 = jax.random.split(key, 5)
    w1, b1 = linear(k1, d_in, d_hid)      # enc hidden
    wmu, bmu = linear(k2, d_hid, d_lat)   # enc mu head
    wlv, blv = linear(k3, d_hid, d_lat)   # enc logvar head
    w3, b3 = linear(k4, d_lat, d_hid)     # dec hidden
    w4, b4 = linear(k5, d_hid, d_in)      # dec output

    padc = d_lat_pad - d_lat
    wmulv = jnp.concatenate([jnp.pad(wmu, ((0, 0), (0, padc))),
                             jnp.pad(wlv, ((0, 0), (0, padc)))], axis=1)
    bmulv = jnp.concatenate([jnp.pad(bmu, ((0, 0), (0, padc))),
                             jnp.pad(blv, ((0, 0), (0, padc)))], axis=1)
    w3p = jnp.pad(w3, ((0, padc), (0, 0)))     # zero rows so padded z lanes contribute nothing

    return dict(
        w1=w1.astype(jnp.bfloat16), b1=b1,
        wmulv=wmulv.astype(jnp.bfloat16), bmulv=bmulv,
        w3=w3p.astype(jnp.bfloat16), b3=b3,
        w4=w4.astype(jnp.bfloat16), b4=b4,
    )


def reference_forward(x, params, eps_padded, d_lat, d_lat_pad):
    """Pure-JAX reference with the same bf16-operand / f32-accumulate matmul recipe."""
    bf = lambda a: a.astype(jnp.bfloat16)
    f32 = jnp.float32

    h = jnp.maximum(jnp.dot(bf(x), params["w1"], preferred_element_type=f32) + params["b1"], 0.0)
    mulv = jnp.dot(bf(h), params["wmulv"], preferred_element_type=f32) + params["bmulv"]
    mu, lv = mulv[:, :d_lat_pad], mulv[:, d_lat_pad:]
    z = eps_padded * jnp.exp(lv * 0.5) + mu
    h2 = jnp.maximum(jnp.dot(bf(z), params["w3"], preferred_element_type=f32) + params["b3"], 0.0)
    gen = jnp.dot(bf(h2), params["w4"], preferred_element_type=f32) + params["b4"]
    return gen, mu[:, :d_lat], lv[:, :d_lat]


if __name__ == "__main__":
    B, D_IN, D_HID, D_LAT = 8, 256, 128, 32

    key = jax.random.PRNGKey(0)
    k_params, k_x, k_eps = jax.random.split(key, 3)

    params = init_params(k_params, D_IN, D_HID, D_LAT)
    x = jax.random.normal(k_x, (B, D_IN), jnp.float32)
    # torch.randn_like(std) equivalent: standard-normal noise sampled host-side so the
    # kernel is deterministic and checkable (could move in-kernel via pltpu.prng_*).
    eps = jax.random.normal(k_eps, (B, D_LAT), jnp.float32)

    gen, z_mu, z_var = vae_forward(x, params, eps)
    jax.block_until_ready((gen, z_mu, z_var))

    # sanity check against pure-JAX reference (bf16 matmul operands => loose tolerance)
    d_lat_pad = params["w3"].shape[0]
    eps_p = jnp.pad(eps, ((0, 0), (0, d_lat_pad - D_LAT)))
    gen_r, mu_r, var_r = reference_forward(x, params, eps_p, D_LAT, d_lat_pad)
    assert jnp.allclose(gen, gen_r, atol=2e-3, rtol=2e-3)
    assert jnp.allclose(z_mu, mu_r, atol=2e-3, rtol=2e-3)
    assert jnp.allclose(z_var, var_r, atol=2e-3, rtol=2e-3)

    print("KERNEL_OK")
</pallas_src>

<mosaic_0001>
module attributes {stable_mosaic.version = 11 : i64} {
  func.func @_vae_kernel(%arg0: i32, %arg1: memref<8x256xf32, #tpu.memory_space<vmem>>, %arg2: memref<256x128xbf16, #tpu.memory_space<vmem>>, %arg3: memref<1x128xf32, #tpu.memory_space<vmem>>, %arg4: memref<128x256xbf16, #tpu.memory_space<vmem>>, %arg5: memref<1x256xf32, #tpu.memory_space<vmem>>, %arg6: memref<8x128xf32, #tpu.memory_space<vmem>>, %arg7: memref<128x128xbf16, #tpu.memory_space<vmem>>, %arg8: memref<1x128xf32, #tpu.memory_space<vmem>>, %arg9: memref<128x256xbf16, #tpu.memory_space<vmem>>, %arg10: memref<1x256xf32, #tpu.memory_space<vmem>>, %arg11: memref<8x256xf32, #tpu.memory_space<vmem>>, %arg12: memref<8x256xf32, #tpu.memory_space<vmem>>) attributes {dimension_semantics = [#tpu.dimension_semantics<parallel>], iteration_bounds = array<i64: 1>, scalar_prefetch = 0 : i64, scratch_operands = 0 : i64, tpu.core_type = #tpu.core_type<tc>, window_params = [{transform_indices = @transform_0, window_bounds = array<i64: 8, 256>}, {pipeline_mode = #tpu.pipeline_mode<synchronous>, transform_indices = @transform_1, window_bounds = array<i64: 256, 128>}, {pipeline_mode = #tpu.pipeline_mode<synchronous>, transform_indices = @transform_2, window_bounds = array<i64: 1, 128>}, {pipeline_mode = #tpu.pipeline_mode<synchronous>, transform_indices = @transform_3, window_bounds = array<i64: 128, 256>}, {pipeline_mode = #tpu.pipeline_mode<synchronous>, transform_indices = @transform_4, window_bounds = array<i64: 1, 256>}, {transform_indices = @transform_5, window_bounds = array<i64: 8, 128>}, {pipeline_mode = #tpu.pipeline_mode<synchronous>, transform_indices = @transform_6, window_bounds = array<i64: 128, 128>}, {pipeline_mode = #tpu.pipeline_mode<synchronous>, transform_indices = @transform_7, window_bounds = array<i64: 1, 128>}, {pipeline_mode = #tpu.pipeline_mode<synchronous>, transform_indices = @transform_8, window_bounds = array<i64: 128, 256>}, {pipeline_mode = #tpu.pipeline_mode<synchronous>, transform_indices = @transform_9, window_bounds = array<i64: 1, 256>}, {transform_indices = @transform_10, window_bounds = array<i64: 8, 256>}, {transform_indices = @transform_11, window_bounds = array<i64: 8, 256>}]} {
    %c0 = arith.constant 0 : index
    %c0_0 = arith.constant 0 : index
    %0 = vector.load %arg1[%c0, %c0_0] : memref<8x256xf32, #tpu.memory_space<vmem>>, vector<8x256xf32>
    %1 = arith.truncf %0 : vector<8x256xf32> to vector<8x256xbf16>
    %c0_1 = arith.constant 0 : index
    %c0_2 = arith.constant 0 : index
    %2 = vector.load %arg2[%c0_1, %c0_2] : memref<256x128xbf16, #tpu.memory_space<vmem>>, vector<256x128xbf16>
    %cst = arith.constant dense<0.000000e+00> : vector<8x128xf32>
    %3 = tpu.matmul %1, %2, %cst {dimension_numbers = #tpu.dot_dimension_numbers<[1], [0], [0], [1], [0, 0, 1, 1], [], []>} : vector<8x256xbf16>, vector<256x128xbf16>, vector<8x128xf32> -> vector<8x128xf32>
    %c0_3 = arith.constant 0 : index
    %c0_4 = arith.constant 0 : index
    %4 = vector.load %arg3[%c0_3, %c0_4] : memref<1x128xf32, #tpu.memory_space<vmem>>, vector<1x128xf32>
    %5 = vector.broadcast %4 : vector<1x128xf32> to vector<8x128xf32>
    %6 = arith.addf %3, %5 : vector<8x128xf32>
    %cst_5 = arith.constant 0.000000e+00 : f32
    %7 = vector.broadcast %cst_5 : f32 to vector<8x128xf32>
    %8 = arith.maximumf %6, %7 : vector<8x128xf32>
    %9 = arith.truncf %8 : vector<8x128xf32> to vector<8x128xbf16>
    %c0_6 = arith.constant 0 : index
    %c0_7 = arith.constant 0 : index
    %10 = vector.load %arg4[%c0_6, %c0_7] : memref<128x256xbf16, #tpu.memory_space<vmem>>, vector<128x256xbf16>
    %cst_8 = arith.constant dense<0.000000e+00> : vector<8x256xf32>
    %11 = tpu.matmul %9, %10, %cst_8 {dimension_numbers = #tpu.dot_dimension_numbers<[1], [0], [0], [1], [0, 0, 1, 1], [], []>} : vector<8x128xbf16>, vector<128x256xbf16>, vector<8x256xf32> -> vector<8x256xf32>
    %c0_9 = arith.constant 0 : index
    %c0_10 = arith.constant 0 : index
    %12 = vector.load %arg5[%c0_9, %c0_10] : memref<1x256xf32, #tpu.memory_space<vmem>>, vector<1x256xf32>
    %13 = vector.broadcast %12 : vector<1x256xf32> to vector<8x256xf32>
    %14 = arith.addf %11, %13 : vector<8x256xf32>
    %c0_11 = arith.constant 0 : index
    %c0_12 = arith.constant 0 : index
    %15 = vector.load %arg12[%c0_11, %c0_12] : memref<8x256xf32, #tpu.memory_space<vmem>>, vector<8x256xf32>
    tpu.vector_store %arg12[%c0_11, %c0_12], %14 {strides = array<i32>} : memref<8x256xf32, #tpu.memory_space<vmem>>, vector<8x256xf32>,
    %16 = vector.extract_strided_slice %14 {offsets = [0, 0], sizes = [8, 128], strides = [1, 1]} : vector<8x256xf32> to vector<8x128xf32>
    %17 = vector.extract_strided_slice %14 {offsets = [0, 128], sizes = [8, 128], strides = [1, 1]} : vector<8x256xf32> to vector<8x128xf32>
    %c0_13 = arith.constant 0 : index
    %c0_14 = arith.constant 0 : index
    %18 = vector.load %arg6[%c0_13, %c0_14] : memref<8x128xf32, #tpu.memory_space<vmem>>, vector<8x128xf32>
    %cst_15 = arith.constant 5.000000e-01 : f32
    %19 = vector.broadcast %cst_15 : f32 to vector<8x128xf32>
    %20 = arith.mulf %17, %19 : vector<8x128xf32>
    %21 = math.exp %20 : vector<8x128xf32>
    %22 = arith.mulf %18, %21 : vector<8x128xf32>
    %23 = arith.addf %22, %16 : vector<8x128xf32>
    %24 = arith.truncf %23 : vector<8x128xf32> to vector<8x128xbf16>
    %c0_16 = arith.constant 0 : index
    %c0_17 = arith.constant 0 : index
    %25 = vector.load %arg7[%c0_16, %c0_17] : memref<128x128xbf16, #tpu.memory_space<vmem>>, vector<128x128xbf16>
    %cst_18 = arith.constant dense<0.000000e+00> : vector<8x128xf32>
    %26 = tpu.matmul %24, %25, %cst_18 {dimension_numbers = #tpu.dot_dimension_numbers<[1], [0], [0], [1], [0, 0, 1, 1], [], []>} : vector<8x128xbf16>, vector<128x128xbf16>, vector<8x128xf32> -> vector<8x128xf32>
    %c0_19 = arith.constant 0 : index
    %c0_20 = arith.constant 0 : index
    %27 = vector.load %arg8[%c0_19, %c0_20] : memref<1x128xf32, #tpu.memory_space<vmem>>, vector<1x128xf32>
    %28 = vector.broadcast %27 : vector<1x128xf32> to vector<8x128xf32>
    %29 = arith.addf %26, %28 : vector<8x128xf32>
    %cst_21 = arith.constant 0.000000e+00 : f32
    %30 = vector.broadcast %cst_21 : f32 to vector<8x128xf32>
    %31 = arith.maximumf %29, %30 : vector<8x128xf32>
    %32 = arith.truncf %31 : vector<8x128xf32> to vector<8x128xbf16>
    %c0_22 = arith.constant 0 : index
    %c0_23 = arith.constant 0 : index
    %33 = vector.load %arg9[%c0_22, %c0_23] : memref<128x256xbf16, #tpu.memory_space<vmem>>, vector<128x256xbf16>
    %cst_24 = arith.constant dense<0.000000e+00> : vector<8x256xf32>
    %34 = tpu.matmul %32, %33, %cst_24 {dimension_numbers = #tpu.dot_dimension_numbers<[1], [0], [0], [1], [0, 0, 1, 1], [], []>} : vector<8x128xbf16>, vector<128x256xbf16>, vector<8x256xf32> -> vector<8x256xf32>
    %c0_25 = arith.constant 0 : index
    %c0_26 = arith.constant 0 : index
    %35 = vector.load %arg10[%c0_25, %c0_26] : memref<1x256xf32, #tpu.memory_space<vmem>>, vector<1x256xf32>
    %36 = vector.broadcast %35 : vector<1x256xf32> to vector<8x256xf32>
    %37 = arith.addf %34, %36 : vector<8x256xf32>
    %c0_27 = arith.constant 0 : index
    %c0_28 = arith.constant 0 : index
    %38 = vector.load %arg11[%c0_27, %c0_28] : memref<8x256xf32, #tpu.memory_space<vmem>>, vector<8x256xf32>
    tpu.vector_store %arg11[%c0_27, %c0_28], %37 {strides = array<i32>} : memref<8x256xf32, #tpu.memory_space<vmem>>, vector<8x256xf32>,
    return
  }
  func.func @transform_0(%arg0: i32) -> (i32, i32) {
    %c0_i32 = arith.constant 0 : i32
    %c0_i32_0 = arith.constant 0 : i32
    return %arg0, %c0_i32 : i32, i32
  }
  func.func @transform_1(%arg0: i32) -> (i32, i32) {
    %c0_i32 = arith.constant 0 : i32
    %c0_i32_0 = arith.constant 0 : i32
    %c0_i32_1 = arith.constant 0 : i32
    return %c0_i32, %c0_i32_0 : i32, i32
  }
  func.func @transform_2(%arg0: i32) -> (i32, i32) {
    %c0_i32 = arith.constant 0 : i32
    %c0_i32_0 = arith.constant 0 : i32
    %c0_i32_1 = arith.constant 0 : i32
    return %c0_i32, %c0_i32_0 : i32, i32
  }
  func.func @transform_3(%arg0: i32) -> (i32, i32) {
    %c0_i32 = arith.constant 0 : i32
    %c0_i32_0 = arith.constant 0 : i32
    %c0_i32_1 = arith.constant 0 : i32
    return %c0_i32, %c0_i32_0 : i32, i32
  }
  func.func @transform_4(%arg0: i32) -> (i32, i32) {
    %c0_i32 = arith.constant 0 : i32
    %c0_i32_0 = arith.constant 0 : i32
    %c0_i32_1 = arith.constant 0 : i32
    return %c0_i32, %c0_i32_0 : i32, i32
  }
  func.func @transform_5(%arg0: i32) -> (i32, i32) {
    %c0_i32 = arith.constant 0 : i32
    %c0_i32_0 = arith.constant 0 : i32
    return %arg0, %c0_i32 : i32, i32
  }
  func.func @transform_6(%arg0: i32) -> (i32, i32) {
    %c0_i32 = arith.constant 0 : i32
    %c0_i32_0 = arith.constant 0 : i32
    %c0_i32_1 = arith.constant 0 : i32
    return %c0_i32, %c0_i32_0 : i32, i32
  }
  func.func @transform_7(%arg0: i32) -> (i32, i32) {
    %c0_i32 = arith.constant 0 : i32
    %c0_i32_0 = arith.constant 0 : i32
    %c0_i32_1 = arith.constant 0 : i32
    return %c0_i32, %c0_i32_0 : i32, i32
  }
  func.func @transform_8(%arg0: i32) -> (i32, i32) {
    %c0_i32 = arith.constant 0 : i32
    %c0_i32_0 = arith.constant 0 : i32
    %c0_i32_1 = arith.constant 0 : i32
    return %c0_i32, %c0_i32_0 : i32, i32
  }
  func.func @transform_9(%arg0: i32) -> (i32, i32) {
    %c0_i32 = arith.constant 0 : i32
    %c0_i32_0 = arith.constant 0 : i32
    %c0_i32_1 = arith.constant 0 : i32
    return %c0_i32, %c0_i32_0 : i32, i32
  }
  func.func @transform_10(%arg0: i32) -> (i32, i32) {
    %c0_i32 = arith.constant 0 : i32
    %c0_i32_0 = arith.constant 0 : i32
    return %arg0, %c0_i32 : i32, i32
  }
  func.func @transform_11(%arg0: i32) -> (i32, i32) {
    %c0_i32 = arith.constant 0 : i32
    %c0_i32_0 = arith.constant 0 : i32
    return %arg0, %c0_i32 : i32, i32
  }
}

</mosaic_0001>

<bundles_post_ra>
// kernel: vae_forward.1
= control target key start
LH: loop header
LB: loop body
LE: loop exit
PB: predicated region body
PF: predicated region fallthrough
CT: control target
= control target key end

     0   :  { %17 = vsyncpa [#allocation3], 0  ;;  %s1234_s0 = inlined_call_operand.vmem [shape: f32[8,256], index: 0, kind: input, shape index: {}]   ;;  %s1235_s1 = inlined_call_operand.hbm [shape: bf16[256,128], index: 1, kind: input, shape index: {}]   ;;  %s1236_s2 = inlined_call_operand.hbm [shape: f32[1,128], index: 2, kind: input, shape index: {}]   ;;  %s1237_s3 = inlined_call_operand.hbm [shape: bf16[128,256], index: 3, kind: input, shape index: {}]   ;;  %s1238_s4 = inlined_call_operand.vmem [shape: f32[1,256], index: 4, kind: input, shape index: {}]   ;;  %s1239_s5 = inlined_call_operand.vmem [shape: f32[8,128], index: 5, kind: input, shape index: {}]   ;;  %s1240_s6 = inlined_call_operand.hbm [shape: bf16[128,128], index: 6, kind: input, shape index: {}]   ;;  %s1241_s7 = inlined_call_operand.vmem [shape: f32[1,128], index: 7, kind: input, shape index: {}]   ;;  %s1242_s8 = inlined_call_operand.hbm [shape: bf16[128,256], index: 8, kind: input, shape index: {}]   ;;  %s1243_s9 = inlined_call_operand.vmem [shape: f32[1,256], index: 9, kind: input, shape index: {}]   ;;  %s1244_s10 = inlined_call_operand.hbm [shape: f32[8,256], index: 10, kind: output, shape index: {0}]   ;;  %s1245_s11 = inlined_call_operand.vmem [shape: f32[8,256], index: 11, kind: output, shape index: {1}]  }
   0x1   :  { %18 = vsyncpa [#allocation6], 0 }
   0x2   :  { %19 = vsyncpa [#allocation9], 0 }
   0x3   :  { %20 = vsyncpa [#allocation4], 0  ;;  %s1065_s17 = smov [#allocation5]   ;;  %s925_s21 = scalar_lea.hbm %s1236_s2, 16 }
   0x4   :  { %s41_s18 = sshll.u32 %s1065_s17, 4  ;;  %p926_p0 = scmp.ne.s32.totalorder %s1236_s2, %s925_s21  ;;  %s42_s18 = int_to_ptr.vmem [resolvable:$true] %s41_s18 }
   0x5   :  { %p929_p1 = scmp.lt.u32.totalorder %s925_s21, %s1236_s2 }
   0x7   :  { %p931_p2 = pnand %p929_p1, %p926_p0 }
   0x9   :  { %934 = shalt.err (!%p931_p2)
}
   0xa   :  { %s935_s26 = scalar_lea.vmem %s42_s18, 16  ;;  %s939_s27 = scalar_lea.vmem %s42_s18, 32 }
   0xb   :  { %p936_p3 = scmp.ne.s32.totalorder %s42_s18, %s935_s26  ;;  %p940_p4 = scmp.lt.s32.totalorder %s42_s18, %s42_s18 }
   0xc   :  { %p941_p5 = scmp.lt.s32.totalorder %s939_s27, %s935_s26 }
   0xe   :  { %p942_p6 = por %p941_p5, %p940_p4 }
  0x10   :  { %p943_p7 = pnand %p942_p6, %p936_p3 }
  0x12   :  { %946 = shalt.err (!%p943_p7)
}
  0x13   :  { %44 = dma.hbm_to_vmem [thread:$0]  %s1236_s2, 16, %s42_s18, [#allocation6]  }
  0x14   :  { %s1066_s30 = smov [#allocation8]   ;;  %s1067_s13 = smov [#allocation2]  }
  0x15   :  { %s66_s12 = sshll.u32 %s1066_s30, 4  ;;  %s28_s14 = sshll.u32 %s1067_s13, 4  ;;  %s67_s12 = int_to_ptr.vmem [resolvable:$true] %s66_s12  ;;  %s29_s14 = int_to_ptr.vmem [resolvable:$true] %s28_s14 }
  0x16   :  { %s947_s17 = scalar_lea.hbm %s1240_s6, 1024 }
  0x17   :  { %p948_p8 = scmp.ne.s32.totalorder %s1240_s6, %s947_s17  ;;  %p951_p9 = scmp.lt.u32.totalorder %s947_s17, %s1240_s6 }
  0x19   :  { %p953_p10 = pnand %p951_p9, %p948_p8 }
  0x1b   :  { %956 = shalt.err (!%p953_p10)
}
  0x1c   :  { %s957_s2 = scalar_lea.vmem %s67_s12, 1024  ;;  %p962_p12 = scmp.lt.s32.totalorder %s67_s12, %s67_s12 }
  0x1d   :  { %p958_p11 = scmp.ne.s32.totalorder %s67_s12, %s957_s2  ;;  %p963_p13 = scmp.lt.s32.totalorder %s957_s2, %s957_s2 }
  0x1f   :  { %p964_p0 = por %p963_p13, %p962_p12 }
  0x21   :  { %p965_p1 = pnand %p964_p0, %p958_p11 }
  0x23   :  { %968 = shalt.err (!%p965_p1)
}
  0x24   :  { %s1068_s18 = smov 64   ;;  %s1069_s23 = smov 4  }
  0x25   :  { %72 = dma.hbm_to_vmem [thread:$0]  %s1240_s6, 1024, %s67_s12, [#allocation9], %s1068_s18, %s1068_s18, %s1069_s23  }
  0x26   :  { %s969_s28 = scalar_lea.hbm %s1235_s1, 2048 }
  0x27   :  { %p970_p2 = scmp.ne.s32.totalorder %s1235_s1, %s969_s28  ;;  %p973_p3 = scmp.lt.u32.totalorder %s969_s28, %s1235_s1 }
  0x29   :  { %p975_p4 = pnand %p973_p3, %p970_p2 }
  0x2b   :  { %978 = shalt.err (!%p975_p4)
}
  0x2c   :  { %s979_s16 = scalar_lea.vmem %s29_s14, 2048  ;;  %p984_p6 = scmp.lt.s32.totalorder %s29_s14, %s29_s14 }
  0x2d   :  { %p980_p5 = scmp.ne.s32.totalorder %s29_s14, %s979_s16  ;;  %p985_p7 = scmp.lt.s32.totalorder %s979_s16, %s979_s16 }
  0x2f   :  { %p986_p8 = por %p985_p7, %p984_p6 }
  0x31   :  { %p987_p9 = pnand %p986_p8, %p980_p5 }
  0x33   :  { %990 = shalt.err (!%p987_p9)
}
  0x34   :  { %34 = dma.hbm_to_vmem [thread:$0]  %s1235_s1, 2048, %s29_s14, [#allocation3], %s1068_s18, %s1068_s18, %s1069_s23  }
  0x35   :  { %s1070_s17 = smov [#allocation7]   ;;  %s991_s22 = scalar_lea.hbm %s1237_s3, 2048 }
  0x36   :  { %s50_s19 = sshll.u32 %s1070_s17, 4  ;;  %p992_p10 = scmp.ne.s32.totalorder %s1237_s3, %s991_s22  ;;  %s51_s19 = int_to_ptr.vmem [resolvable:$true] %s50_s19 }
  0x37   :  { %p995_p11 = scmp.lt.u32.totalorder %s991_s22, %s1237_s3 }
  0x39   :  { %p997_p12 = pnand %p995_p11, %p992_p10 }
  0x3b   :  { %1000 = shalt.err (!%p997_p12)
}
  0x3c   :  { %s1001_s27 = scalar_lea.vmem %s51_s19, 2048  ;;  %p1006_p0 = scmp.lt.s32.totalorder %s51_s19, %s51_s19 }
  0x3d   :  { %p1002_p13 = scmp.ne.s32.totalorder %s51_s19, %s1001_s27  ;;  %p1007_p1 = scmp.lt.s32.totalorder %s1001_s27, %s1001_s27 }
  0x3f   :  { %p1008_p2 = por %p1007_p1, %p1006_p0 }
  0x41   :  { %p1009_p3 = pnand %p1008_p2, %p1002_p13 }
  0x43   :  { %1012 = shalt.err (!%p1009_p3)
}
  0x44   :  { %s1071_s1 = smov 128   ;;  %s1072_s14 = smov 8  }
  0x45   :  { %56 = dma.hbm_to_vmem [thread:$0]  %s1237_s3, 2048, %s51_s19, [#allocation6], %s1071_s1, %s1071_s1, %s1072_s14  }
  0x46   :  { %s1073_s28 = smov [#allocation10]   ;;  %s1013_s15 = scalar_lea.hbm %s1242_s8, 2048 }
  0x47   :  { %s80_s29 = sshll.u32 %s1073_s28, 4  ;;  %p1014_p4 = scmp.ne.s32.totalorder %s1242_s8, %s1013_s15  ;;  %s81_s29 = int_to_ptr.vmem [resolvable:$true] %s80_s29 }
  0x48   :  { %p1017_p5 = scmp.lt.u32.totalorder %s1013_s15, %s1242_s8 }
  0x4a   :  { %p1019_p6 = pnand %p1017_p5, %p1014_p4 }
  0x4c   :  { %1022 = shalt.err (!%p1019_p6)
}
  0x4d   :  { %s1023_s20 = scalar_lea.vmem %s81_s29, 2048  ;;  %p1028_p8 = scmp.lt.s32.totalorder %s81_s29, %s81_s29 }
  0x4e   :  { %p1024_p7 = scmp.ne.s32.totalorder %s81_s29, %s1023_s20  ;;  %p1029_p9 = scmp.lt.s32.totalorder %s1023_s20, %s1023_s20 }
  0x50   :  { %p1030_p10 = por %p1029_p9, %p1028_p8 }
  0x52   :  { %p1031_p11 = pnand %p1030_p10, %p1024_p7 }
  0x54   :  { %1034 = shalt.err (!%p1031_p11)
}
  0x55   :  { %86 = dma.hbm_to_vmem [thread:$0]  %s1242_s8, 2048, %s81_s29, [#allocation9], %s1071_s1, %s1071_s1, %s1072_s14  }
  0x56   :  { %1057 = dma.done.wait [#allocation3], 2048  }
  0x57   :  { %1058 = vsyncadd [#allocation3], 4294965248 }
  0x58   :  { %1059 = dma.done.wait [#allocation6], 2064  }
  0x59   :  { %1060 = vsyncadd [#allocation6], 4294965232 }
  0x5a   :  { %1061 = dma.done.wait [#allocation9], 3072  }
  0x5b   :  { %1062 = vsyncadd [#allocation9], 4294964224  ;;  %v851_v0 = vld [vmem:[#allocation2 + $0x40] sm:$0xff]   ;;  %v853_v2 = vld [vmem:[#allocation2 + $0x48] sm:$0xff]   ;;  %v1074_v36 = vmov 0   ;;  %v1075_v38 = vmov 0.0  }
  0x5c   :  { %v852_v1 = vld [vmem:[#allocation2] sm:$0xff]   ;;  %787 = vmatprep.subr.bf16.mxu0 %v851_v0  ;;  %v854_v3 = vld [vmem:[#allocation2 + $0x8] sm:$0xff]   ;;  %v855_v4 = vld [vmem:[#allocation2 + $0x50] sm:$0xff]   ;;  %426 = vmatprep.mubr.bf16.mxu1 %v1074_v36  ;;  %vm1076_vm0 = vmmov 0   ;;  %s1077_s28 = smov [#allocation11]  }
  0x5d   :  { %788 = vmatpush3.bf16.msra.mxu0 %v852_v1  ;;  %v856_v5 = vld [vmem:[#allocation2 + $0x10] sm:$0xff]   ;;  %v857_v6 = vld [vmem:[#allocation2 + $0x58] sm:$0xff]   ;;  %v859_v8 = vld [vmem:[#allocation2 + $0x60] sm:$0xff]   ;;  %s714_s29 = sshll.u32 %s1077_s28, 4  ;;  %s715_s29 = int_to_ptr.vmem [resolvable:$true] %s714_s29 }
  0x5e   :  { %789 = vmatprep.subr.bf16.mxu0 %v853_v2  ;;  %v858_v7 = vld [vmem:[#allocation2 + $0x18] sm:$0xff]   ;;  %v860_v9 = vld [vmem:[#allocation2 + $0x20] sm:$0xff]   ;;  %v861_v10 = vld [vmem:[#allocation2 + $0x68] sm:$0xff]   ;;  %p1040_p13 = scmp.lt.s32.totalorder %s715_s29, %s715_s29 }
  0x5f   :  { %v106_v11 = vld [vmem:[%s1234_s0 + $0x8] sm:$0xff]  ;;  %v870_v15 = vld [vmem:[#allocation7 + $0x14] ss:$8 sps:$4 sm:$0xff]   ;;  %v872_v19 = vld [vmem:[#allocation7 + $0x10] ss:$8 sps:$4 sm:$0xff]  }
  0x60   :  { %v108_v12 = vpack.c.bf16 %v106_v11, %v106_v11  ;;  %v867_v13 = vld [vmem:[#allocation7 + $0x4] ss:$8 sps:$4 sm:$0xff]   ;;  %v869_v14 = vld [vmem:[#allocation7] ss:$8 sps:$4 sm:$0xff]   ;;  %v865_v21 = vld [vmem:[#allocation2 + $0x78] sm:$0xff]  }
  0x61   :  { %790 = vmatpush3.bf16.msra.mxu0 %v854_v3  ;;  %v862_v16 = vld [vmem:[#allocation2 + $0x28] sm:$0xff]   ;;  %v863_v17 = vld [vmem:[#allocation2 + $0x70] sm:$0xff]   ;;  %394 = vmatprep.subr.bf16.mxu1 %v867_v13  ;;  %v866_v24 = vld [vmem:[#allocation2 + $0x38] sm:$0xff]  }
  0x62   :  { %791 = vmatprep.subr.bf16.mxu0 %v855_v4  ;;  %276 = vmatprep.mubr.bf16.mxu0 %v108_v12  ;;  %v864_v18 = vld [vmem:[#allocation2 + $0x30] sm:$0xff]   ;;  %v875_v22 = vld [vmem:[#allocation7 + $0x20] ss:$8 sps:$4 sm:$0xff]   ;;  %v729_v41 = vld [vmem:[#allocation5] ss:$0 sm:$0xff] }
  0x63   :  { %395 = vmatpush1.bf16.msra.mxu1 %v869_v14  ;;  %v873_v20 = vld [vmem:[#allocation7 + $0x24] ss:$8 sps:$4 sm:$0xff]   ;;  %v876_v23 = vld [vmem:[#allocation7 + $0x34] ss:$8 sps:$4 sm:$0xff]   ;;  %v878_v26 = vld [vmem:[#allocation7 + $0x30] ss:$8 sps:$4 sm:$0xff]  }
  0x64   :  { %396 = vmatprep.subr.bf16.mxu1 %v870_v15  ;;  %v105_v25 = vld [vmem:[%s1234_s0] sm:$0xff]  ;;  %v884_v31 = vld [vmem:[#allocation7 + $0x50] ss:$8 sps:$4 sm:$0xff]   ;;  %v892_v39 = vld [vmem:[#allocation8 + $0x8] sm:$0xff]  }
  0x65   :  { %792 = vmatpush3.bf16.msra.mxu0 %v856_v5  ;;  %v879_v27 = vld [vmem:[#allocation7 + $0x44] ss:$8 sps:$4 sm:$0xff]   ;;  %v107_v28 = vpack.c.bf16 %v105_v25, %v105_v25  ;;  %v881_v29 = vld [vmem:[#allocation7 + $0x40] ss:$8 sps:$4 sm:$0xff]   ;;  %v882_v30 = vld [vmem:[#allocation7 + $0x54] ss:$8 sps:$4 sm:$0xff]   ;;  %v304_v5 = vlaneseq }
  0x66   :  { %793 = vmatprep.subr.bf16.mxu0 %v857_v6  ;;  %v885_v32 = vld [vmem:[#allocation7 + $0x64] ss:$8 sps:$4 sm:$0xff]   ;;  %v887_v33 = vld [vmem:[#allocation7 + $0x60] ss:$8 sps:$4 sm:$0xff]   ;;  %v888_v34 = vld [vmem:[#allocation7 + $0x74] ss:$8 sps:$4 sm:$0xff]  }
  0x67   :  { %397 = vmatpush1.bf16.msra.mxu1 %v872_v19  ;;  %v890_v35 = vld [vmem:[#allocation7 + $0x70] ss:$8 sps:$4 sm:$0xff]   ;;  %v891_v37 = vld [vmem:[#allocation8] sm:$0xff]   ;;  %v896_v52 = vld [vmem:[#allocation8 + $0x28] sm:$0xff]   ;;  %v305_v6 = vshrl.u32 %v304_v5, 7 }
  0x68   :  { %398 = vmatprep.subr.bf16.mxu1 %v873_v20  ;;  %v893_v49 = vld [vmem:[#allocation8 + $0x10] sm:$0xff]   ;;  %v894_v50 = vld [vmem:[#allocation8 + $0x18] sm:$0xff]   ;;  %v895_v51 = vld [vmem:[#allocation8 + $0x20] sm:$0xff]  }
  0x69   :  { %794 = vmatpush3.bf16.msra.mxu0 %v858_v7  ;;  %v897_v53 = vld [vmem:[#allocation8 + $0x30] sm:$0xff]   ;;  %v898_v54 = vld [vmem:[#allocation8 + $0x38] sm:$0xff]   ;;  %v899_v55 = vld [vmem:[#allocation10] ss:$8 sps:$4 sm:$0xff]   ;;  %v306_v7 = vsub.s32 0, %v305_v6 }
  0x6a   :  { %795 = vmatprep.subr.bf16.mxu0 %v859_v8  ;;  %v901_v56 = vld [vmem:[#allocation10 + $0x4] ss:$8 sps:$4 sm:$0xff]   ;;  %v904_v57 = vld [vmem:[#allocation10 + $0x14] ss:$8 sps:$4 sm:$0xff]   ;;  %v902_v58 = vld [vmem:[#allocation10 + $0x10] ss:$8 sps:$4 sm:$0xff]  }
  0x6b   :  { %399 = vmatpush1.bf16.msra.mxu1 %v875_v22  ;;  %v907_v59 = vld [vmem:[#allocation10 + $0x24] ss:$8 sps:$4 sm:$0xff]   ;;  %v905_v60 = vld [vmem:[#allocation10 + $0x20] ss:$8 sps:$4 sm:$0xff]   ;;  %v910_v61 = vld [vmem:[#allocation10 + $0x34] ss:$8 sps:$4 sm:$0xff]  }
  0x6c   :  { %400 = vmatprep.subr.bf16.mxu1 %v876_v23  ;;  %v908_v62 = vld [vmem:[#allocation10 + $0x30] ss:$8 sps:$4 sm:$0xff]   ;;  %v913_v63 = vld [vmem:[#allocation10 + $0x44] ss:$8 sps:$4 sm:$0xff]   ;;  %v911_v0 = vld [vmem:[#allocation10 + $0x40] ss:$8 sps:$4 sm:$0xff]  }
  0x6d   :  { %796 = vmatpush3.bf16.msra.mxu0 %v860_v9  ;;  %v916_v1 = vld [vmem:[#allocation10 + $0x54] ss:$8 sps:$4 sm:$0xff]   ;;  %v914_v2 = vld [vmem:[#allocation10 + $0x50] ss:$8 sps:$4 sm:$0xff]   ;;  %v919_v3 = vld [vmem:[#allocation10 + $0x64] ss:$8 sps:$4 sm:$0xff]  }
  0x6e   :  { %797 = vmatprep.subr.bf16.mxu0 %v861_v10  ;;  %v917_v4 = vld [vmem:[#allocation10 + $0x60] ss:$8 sps:$4 sm:$0xff]   ;;  %v302_v8 = vld [vmem:[%s1238_s4] sm:$0x3]  ;;  %v310_v9 = vsub.s32 1, %v305_v6 }
  0x6f   :  { %401 = vmatpush1.bf16.msra.mxu1 %v878_v26  ;;  %v307_v10 = vrot.slane %v302_v8, %v306_v7  ;;  %v437_v20 = vld [vmem:[%s1239_s5] sm:$0xff]  ;;  %v920_v26 = vld [vmem:[#allocation10 + $0x70] ss:$8 sps:$4 sm:$0xff]  }
  0x70   :  { %402 = vmatprep.subr.bf16.mxu1 %v879_v27  ;;  %v311_v11 = vrot.slane %v302_v8, %v310_v9  ;;  %v922_v25 = vld [vmem:[#allocation10 + $0x74] ss:$8 sps:$4 sm:$0xff]  }
  0x71   :  { %798 = vmatpush3.bf16.msra.mxu0 %v862_v16  ;;  %v762_v27 = vld [vmem:[%s1241_s7] ss:$0 sm:$0xff]  ;;  %s1035_s7 = scalar_lea.vmem %s715_s29, 256 }
  0x72   :  { %799 = vmatprep.subr.bf16.mxu0 %v863_v17  ;;  %p1036_p12 = scmp.ne.s32.totalorder %s715_s29, %s1035_s7  ;;  %p1041_p0 = scmp.lt.s32.totalorder %s1035_s7, %s1035_s7 }
  0x73   :  { %403 = vmatpush1.bf16.msra.mxu1 %v881_v29 }
  0x74   :  { %404 = vmatprep.subr.bf16.mxu1 %v882_v30  ;;  %p1042_p1 = por %p1041_p0, %p1040_p13 }
  0x75   :  { %800 = vmatpush3.bf16.msra.mxu0 %v864_v18 }
  0x76   :  { %801 = vmatprep.subr.bf16.mxu0 %v865_v21  ;;  %p1043_p2 = pnand %p1042_p1, %p1036_p12 }
  0x77   :  { %405 = vmatpush1.bf16.msra.mxu1 %v884_v31 }
  0x78   :  { %406 = vmatprep.subr.bf16.mxu1 %v885_v32 }
  0x79   :  { %802 = vmatpush3.bf16.msra.mxu0 %v866_v24 }
  0x7a   :  { %818 = vmatprep.subr.bf16.mxu0 %v1075_v38 }
  0x7b   :  { %407 = vmatpush1.bf16.msra.mxu1 %v887_v33 }
  0x7c   :  { %277 = vmatmul.mubr.bf16.vlgmr.msra.gmra.mrb[0].mxu0 %v107_v28  ;;  %408 = vmatprep.subr.bf16.mxu1 %v888_v34 }
  0x7d   :  { %819 = vmatpush3.bf16.msra.mxu0 %v891_v37  ;;  %834 = vmatprep.mubr.msk.bf16.mxu0 %vm1076_vm0, %v1075_v38 }
  0x7e   :  { %820 = vmatprep.subr.bf16.mxu0 %v1075_v38 }
  0x7f   :  { %409 = vmatpush1.bf16.msra.mxu1 %v890_v35  ;;  %v573_v35 = vld [vmem:[%s1243_s9] sm:$0x3] }
  0x80   :  { %665 = vmatprep.subr.bf16.mxu1 %v901_v56  ;;  %v582_v37 = vrot.slane %v573_v35, %v310_v9 }
  0x81   :  { %821 = vmatpush3.bf16.msra.mxu0 %v892_v39 }
  0x82   :  { %822 = vmatprep.subr.bf16.mxu0 %v1075_v38 }
  0x85   :  { %823 = vmatpush3.bf16.msra.mxu0 %v893_v49 }
  0x86   :  { %824 = vmatprep.subr.bf16.mxu0 %v1075_v38 }
  0x89   :  { %825 = vmatpush3.bf16.msra.mxu0 %v894_v50 }
  0x8a   :  { %826 = vmatprep.subr.bf16.mxu0 %v1075_v38 }
  0x8d   :  { %827 = vmatpush3.bf16.msra.mxu0 %v895_v51 }
  0x8e   :  { %828 = vmatprep.subr.bf16.mxu0 %v1075_v38 }
  0x91   :  { %829 = vmatpush3.bf16.msra.mxu0 %v896_v52 }
  0x92   :  { %830 = vmatprep.subr.bf16.mxu0 %v1075_v38 }
  0x95   :  { %831 = vmatpush3.bf16.msra.mxu0 %v897_v53 }
  0x96   :  { %832 = vmatprep.subr.bf16.mxu0 %v1075_v38 }
  0x99   :  { %833 = vmatpush3.bf16.msra.mxu0 %v898_v54 }
 0x14f   :  { %v803_v40 = vpop.f32.mrb[0].mxu0 }
 0x150   :  { %v804_v42 = vpop.f32.mrb[1].mxu0 }
 0x151   :  { %v805_v43 = vadd.f32 %v804_v42, %v803_v40  ;;  %v806_v44 = vpop.f32.mrb[2].mxu0 }
 0x152   :  { %v807_v45 = vpop.f32.mrb[3].mxu0 }
 0x153   :  { %v279_v46 = vadd.f32 %v805_v43, %v729_v41 }
 0x155   :  { %v284_v47 = vmax.f32 %v279_v46, 0.0 }
 0x157   :  { %v285_v48 = vpack.c.bf16 %v284_v47, %v284_v47 }
 0x159   :  { %427 = vmatmul.mubr.bf16.vlgmr.msra.gmra.mrb[0].mxu1 %v285_v48 }
 0x15a   :  { %697 = vmatprep.mubr.bf16.mxu1 %v1074_v36  ;;  %666 = vmatpush1.bf16.msra.mxu1 %v899_v55  ;;  %v578_v36 = vrot.slane %v573_v35, %v306_v7 }
 0x15b   :  { %667 = vmatprep.subr.bf16.mxu1 %v904_v57 }
 0x15e   :  { %668 = vmatpush1.bf16.msra.mxu1 %v902_v58 }
 0x15f   :  { %669 = vmatprep.subr.bf16.mxu1 %v907_v59 }
 0x162   :  { %670 = vmatpush1.bf16.msra.mxu1 %v905_v60 }
 0x163   :  { %671 = vmatprep.subr.bf16.mxu1 %v910_v61 }
 0x166   :  { %672 = vmatpush1.bf16.msra.mxu1 %v908_v62 }
 0x167   :  { %673 = vmatprep.subr.bf16.mxu1 %v913_v63 }
 0x16a   :  { %674 = vmatpush1.bf16.msra.mxu1 %v911_v0 }
 0x16b   :  { %675 = vmatprep.subr.bf16.mxu1 %v916_v1 }
 0x16e   :  { %676 = vmatpush1.bf16.msra.mxu1 %v914_v2 }
 0x16f   :  { %677 = vmatprep.subr.bf16.mxu1 %v919_v3 }
 0x172   :  { %678 = vmatpush1.bf16.msra.mxu1 %v917_v4 }
 0x173   :  { %679 = vmatprep.subr.bf16.mxu1 %v922_v25 }
 0x176   :  { %680 = vmatpush1.bf16.msra.mxu1 %v920_v26 }
 0x22c   :  { %v428_v12 = vpop.f32.mrb[0].mxu1 }
 0x22d   :  { %v429_v13 = vadd.f32 %v428_v12, %v307_v10  ;;  %v430_v14 = vpop.f32.mrb[1].mxu1 }
 0x22e   :  { %v431_v15 = vadd.f32 %v430_v14, %v311_v11  ;;  %v432_v16 = vpop.f32.mrb[2].mxu1 }
 0x22f   :  { %435 = vst [vmem:[%s1245_s11] sm:$0xff] %v429_v13  ;;  %v433_v17 = vpop.f32.mrb[3].mxu1 }
 0x230   :  { %436 = vst [vmem:[%s1245_s11 + $0x8] sm:$0xff] %v431_v15  ;;  %v438_v18 = vmul.f32 0.5, %v431_v15 }
 0x232   :  { %v439_v19 = vmul.f32 1.442695, %v438_v18 }
 0x234   :  { %923 = vpow2.f32 %v439_v19 }
 0x23e   :  { %v924_v21 = vpop.eup %923 }
 0x23f   :  { %v441_v22 = vmul.f32 %v924_v21, %v437_v20 }
 0x241   :  { %v442_v23 = vadd.f32 %v441_v22, %v429_v13 }
 0x243   :  { %v443_v24 = vpack.c.bf16 %v442_v23, %v442_v23 }
 0x245   :  { %835 = vmatmul.mubr.bf16.vlgmr.msra.gmra.mrb[4].mxu0 %v443_v24 }
 0x318   :  { %v549_v28 = vpop.f32.mrb[4].mxu0 }
 0x319   :  { %v550_v29 = vadd.f32 %v762_v27, %v549_v28  ;;  %v836_v30 = vpop.f32.mrb[5].mxu0 }
 0x31a   :  { %v552_v31 = vpop.f32.mrb[6].mxu0 }
 0x31b   :  { %v555_v32 = vmax.f32 %v550_v29, 0.0  ;;  %v837_v33 = vpop.f32.mrb[7].mxu0 }
 0x31d   :  { %v556_v34 = vpack.c.bf16 %v555_v32, %v555_v32 }
 0x31f   :  { %698 = vmatmul.mubr.bf16.vlgmr.msra.gmra.mrb[4].mxu1 %v556_v34 }
 0x3f2   :  { %v699_v38 = vpop.f32.mrb[4].mxu1 }
 0x3f3   :  { %v700_v39 = vadd.f32 %v699_v38, %v578_v36  ;;  %v701_v40 = vpop.f32.mrb[5].mxu1 }
 0x3f4   :  { %v702_v41 = vadd.f32 %v701_v40, %v582_v37  ;;  %v703_v42 = vpop.f32.mrb[6].mxu1 }
 0x3f5   :  { %706 = vst [vmem:[#allocation11] sm:$0xff] %v700_v39  ;;  %v704_v43 = vpop.f32.mrb[7].mxu1 }
 0x3f6   :  { %707 = vst [vmem:[#allocation11 + $0x8] sm:$0xff] %v702_v41 }
 0x3f7   :  { %1046 = shalt.err (!%p1043_p2)
}
 0x3f8   :  { %s1047_s13 = scalar_lea.hbm %s1244_s10, 256 }
 0x3f9   :  { %p1048_p3 = scmp.ne.s32.totalorder %s1244_s10, %s1047_s13  ;;  %p1051_p4 = scmp.lt.u32.totalorder %s1047_s13, %s1244_s10 }
 0x3fb   :  { %p1053_p5 = pnand %p1051_p4, %p1048_p3 }
 0x3fd   :  { %1056 = shalt.err (!%p1053_p5)
}
 0x3fe   :  { %717 = dma.vmem_to_hbm [thread:$0]  %s715_s29, 256, %s1244_s10, [#allocation4]  }
 0x3ff   :  { %1063 = dma.done.wait [#allocation4], 256  }
 0x400   :  { %1064 = vsyncadd [#allocation4], 4294967040 }
 0x401   :  { %725 = vsyncpa [#allocation3], 1 }
 0x402   :  { %726 = vsyncpa [#allocation6], 1 }
 0x403   :  { %727 = vsyncpa [#allocation9], 1 }
 0x404   :  { %728 = vsyncpa [#allocation4], 1 }

</bundles_post_ra>
